<compile_context>
chip_gen: v5e
topology: v5e:2x2
jax: 0.10.0
libtpu: 0.0.40
codegen_flags: <defaults>
</compile_context>

<pallas_src>
import functools

import jax
import jax.numpy as jnp
from jax import lax
from jax.experimental import pallas as pl
from jax.experimental.pallas import tpu as pltpu


# ---------------------------------------------------------------------------
# Fused kernel: NB images per grid step, merged along the lane axis.
#   x_ref   : (Cin, L)        L = NB*H*W, channel-first, spatial+image flattened
#   s1,b1   : (Cin, 1)        folded BN1 scale / shift (broadcast over lanes)
#   w1_ref  : (Cb, Cin) bf16  1x1 conv weight with BN2 scale pre-folded
#   sh2     : (Cb, 1)         BN2 shift
#   w2_ref  : (9*Cout, Cb) bf16  3x3 conv weights, tap-major
#   m_ref   : (9, Cout, L)    precomputed 0/1 boundary masks per tap
#   o_ref   : (Cout, L)       output (lane-dense: lanes = NB*H*W)
# ---------------------------------------------------------------------------
def _dense_layer_kernel(x_ref, s1_ref, b1_ref, w1_ref, sh2_ref, w2_ref, m_ref,
                        o_ref, *, W):
    Cout, L = o_ref.shape

    # ---- BN1 + ReLU1 (f32 elementwise; per-channel scale/shift broadcast) ----
    a = jnp.maximum(x_ref[...] * s1_ref[...] + b1_ref[...], 0.0)        # (Cin, L)

    # ---- Conv1x1 (bf16 operands, f32 acc; BN2 scale folded) + shift + ReLU2 ----
    y = jnp.dot(w1_ref[...], a.astype(jnp.bfloat16),
                preferred_element_type=jnp.float32)                     # (Cb, L)
    a2 = jnp.maximum(y + sh2_ref[...], 0.0)                             # (Cb, L)

    # ---- Conv3x3: one stacked matmul, then per-tap lane roll * resident mask ----
    p = jnp.dot(w2_ref[...], a2.astype(jnp.bfloat16),
                preferred_element_type=jnp.float32)                     # (9*Cout, L)

    # Center tap (dh=dw=0) needs no mask: initialize the accumulator from it.
    acc = p[4 * Cout:5 * Cout, :]
    for k in range(9):
        if k == 4:
            continue
        dh, dw = k // 3 - 1, k % 3 - 1
        shift = dh * W + dw
        pk = p[k * Cout:(k + 1) * Cout, :]        # sublane-aligned slice (Cout, L)
        # rolled[:, i] = pk[:, i + shift] (circular; wraps / cross-image
        # contamination land only on positions the mask zeroes).
        rolled = pltpu.roll(pk, (-shift) % L, 1)
        acc = acc + rolled * m_ref[k]
    o_ref[...] = acc


def _fold_bn(gamma, beta, mean, var, eps=1e-5):
    scale = gamma / jnp.sqrt(var + eps)
    shift = beta - mean * scale
    return scale.reshape(-1, 1), shift.reshape(-1, 1)      # column vectors


def _pick_nb(N, HW, cap=8):
    """Images merged per grid step. Largest divisor of N that is <= cap."""
    if HW % 128 != 0:
        return N          # single full-extent step keeps lane dim unconstrained
    for nb in range(min(N, cap), 0, -1):
        if N % nb == 0:
            return nb
    return 1


@jax.jit
def dense_layer_forward(x_nchw, params):
    """DenseLayer forward. x_nchw: (N, Cin, H, W) f32 -> (N, growth_rate, H, W)."""
    (g1, b1, m1, v1, w1, g2, b2, m2, v2, w2) = params
    N, Cin, H, W = x_nchw.shape
    Cb = w1.shape[0]      # bn_size * growth_rate   (w1: (Cb, Cin, 1, 1))
    Cout = w2.shape[0]    # growth_rate             (w2: (Cout, Cb, 3, 3))
    HW = H * W
    NB = _pick_nb(N, HW)
    L = NB * HW

    # ---- parameter folding / casts (plain JAX, tiny) ----
    s1, sh1 = _fold_bn(g1, b1, m1, v1)                      # (Cin, 1) each
    s2, sh2 = _fold_bn(g2, b2, m2, v2)                      # (Cb, 1) each
    w1f = (w1[:, :, 0, 0] * s2).astype(jnp.bfloat16)        # (Cb, Cin), BN2 scale folded
    w2s = jnp.transpose(w2, (2, 3, 0, 1)).reshape(9 * Cout, Cb)
    w2s = w2s.astype(jnp.bfloat16)                          # tap-major (9*Cout, Cb)

    # ---- precomputed boundary masks: (9, Cout, L), repeated per image ----
    pos = jnp.arange(HW, dtype=jnp.int32)
    row, col = pos // W, pos % W
    tap_masks = []
    for kh in range(3):
        for kw in range(3):
            dh, dw = kh - 1, kw - 1
            m = ((row + dh >= 0) & (row + dh < H) &
                 (col + dw >= 0) & (col + dw < W)).astype(jnp.float32)
            tap_masks.append(m)
    masks = jnp.stack(tap_masks)                            # (9, HW)
    masks = jnp.tile(masks, (1, NB))                        # (9, L)
    masks = jnp.broadcast_to(masks[:, None, :], (9, Cout, L))

    # NCHW -> (Cin, N*HW): channels on sublanes, images merged along lanes.
    x_cl = jnp.transpose(x_nchw, (1, 0, 2, 3)).reshape(Cin, N * HW)

    kernel = functools.partial(_dense_layer_kernel, W=W)
    out = pl.pallas_call(
        kernel,
        out_shape=jax.ShapeDtypeStruct((Cout, N * HW), jnp.float32),
        grid=(N // NB,),
        in_specs=[
            pl.BlockSpec((Cin, L), lambda n: (0, n)),
            pl.BlockSpec((Cin, 1), lambda n: (0, 0)),       # grid-invariant -> resident
            pl.BlockSpec((Cin, 1), lambda n: (0, 0)),
            pl.BlockSpec((Cb, Cin), lambda n: (0, 0)),
            pl.BlockSpec((Cb, 1), lambda n: (0, 0)),
            pl.BlockSpec((9 * Cout, Cb), lambda n: (0, 0)),
            pl.BlockSpec((9, Cout, L), lambda n: (0, 0, 0)),
        ],
        out_specs=pl.BlockSpec((Cout, L), lambda n: (0, n)),
        compiler_params=pltpu.CompilerParams(dimension_semantics=("parallel",)),
    )(x_cl, s1, sh1, w1f, sh2, w2s, masks)

    # (Cout, N*HW) -> (N, Cout, H, W)
    return jnp.transpose(out.reshape(Cout, N, H, W), (1, 0, 2, 3))


# ---------------------------------------------------------------------------
# Pure-JAX f32 reference (NHWC convs) used for the correctness check.
# ---------------------------------------------------------------------------
def _reference(x_nchw, params):
    (g1, b1, m1, v1, w1, g2, b2, m2, v2, w2) = params
    eps = 1e-5
    x = jnp.transpose(x_nchw, (0, 2, 3, 1))
    a = jnp.maximum((x - m1) / jnp.sqrt(v1 + eps) * g1 + b1, 0.0)
    y = lax.conv_general_dilated(
        a, jnp.transpose(w1, (2, 3, 1, 0)), (1, 1), "VALID",
        dimension_numbers=("NHWC", "HWIO", "NHWC"))
    a2 = jnp.maximum((y - m2) / jnp.sqrt(v2 + eps) * g2 + b2, 0.0)
    o = lax.conv_general_dilated(
        a2, jnp.transpose(w2, (2, 3, 1, 0)), (1, 1), ((1, 1), (1, 1)),
        dimension_numbers=("NHWC", "HWIO", "NHWC"))
    return jnp.transpose(o, (0, 3, 1, 2))


if __name__ == "__main__":
    # DenseLayer(num_input_features=8, growth_rate=8, bn_size=4, drop_rate=0.0)
    N, Cin, H, W = 2, 8, 16, 16
    growth_rate, bn_size = 8, 4
    Cb = bn_size * growth_rate       # 32
    Cout = growth_rate               # 8

    key = jax.random.PRNGKey(0)
    ks = jax.random.split(key, 11)
    x = jax.random.normal(ks[0], (N, Cin, H, W), jnp.float32)

    params = (
        1.0 + 0.1 * jax.random.normal(ks[1], (Cin,), jnp.float32),     # gamma1
        0.1 * jax.random.normal(ks[2], (Cin,), jnp.float32),           # beta1
        0.1 * jax.random.normal(ks[3], (Cin,), jnp.float32),           # running_mean1
        0.5 + jnp.abs(jax.random.normal(ks[4], (Cin,), jnp.float32)),  # running_var1
        0.1 * jax.random.normal(ks[5], (Cb, Cin, 1, 1), jnp.float32),  # conv1 weight
        1.0 + 0.1 * jax.random.normal(ks[6], (Cb,), jnp.float32),      # gamma2
        0.1 * jax.random.normal(ks[7], (Cb,), jnp.float32),            # beta2
        0.1 * jax.random.normal(ks[8], (Cb,), jnp.float32),            # running_mean2
        0.5 + jnp.abs(jax.random.normal(ks[9], (Cb,), jnp.float32)),   # running_var2
        0.1 * jax.random.normal(ks[10], (Cout, Cb, 3, 3), jnp.float32),  # conv2 weight
    )

    out = dense_layer_forward(x, params)
    out = jax.block_until_ready(out)
    assert out.shape == (N, Cout, H, W), out.shape

    ref = jax.block_until_ready(_reference(x, params))
    err = float(jnp.max(jnp.abs(out - ref)))
    # bf16 matmul operands (f32 accumulate) -> a few 1e-3 max-abs error vs the
    # full-f32 reference; 2e-2 gives comfortable margin on outputs of O(0.5).
    assert err < 2e-2, f"max abs err {err}"

    print("KERNEL_OK")
</pallas_src>

<mosaic_0001>
module attributes {stable_mosaic.version = 11 : i64} {
  func.func @_dense_layer_kernel(%arg0: i32, %arg1: memref<8x512xf32, #tpu.memory_space<vmem>>, %arg2: memref<8x1xf32, #tpu.memory_space<vmem>>, %arg3: memref<8x1xf32, #tpu.memory_space<vmem>>, %arg4: memref<32x8xbf16, #tpu.memory_space<vmem>>, %arg5: memref<32x1xf32, #tpu.memory_space<vmem>>, %arg6: memref<72x32xbf16, #tpu.memory_space<vmem>>, %arg7: memref<9x8x512xf32, #tpu.memory_space<vmem>>, %arg8: memref<8x512xf32, #tpu.memory_space<vmem>>) attributes {dimension_semantics = [#tpu.dimension_semantics<parallel>], iteration_bounds = array<i64: 1>, scalar_prefetch = 0 : i64, scratch_operands = 0 : i64, tpu.core_type = #tpu.core_type<tc>, window_params = [{transform_indices = @transform_0, window_bounds = array<i64: 8, 512>}, {pipeline_mode = #tpu.pipeline_mode<synchronous>, transform_indices = @transform_1, window_bounds = array<i64: 8, 1>}, {pipeline_mode = #tpu.pipeline_mode<synchronous>, transform_indices = @transform_2, window_bounds = array<i64: 8, 1>}, {pipeline_mode = #tpu.pipeline_mode<synchronous>, transform_indices = @transform_3, window_bounds = array<i64: 32, 8>}, {pipeline_mode = #tpu.pipeline_mode<synchronous>, transform_indices = @transform_4, window_bounds = array<i64: 32, 1>}, {pipeline_mode = #tpu.pipeline_mode<synchronous>, transform_indices = @transform_5, window_bounds = array<i64: 72, 32>}, {pipeline_mode = #tpu.pipeline_mode<synchronous>, transform_indices = @transform_6, window_bounds = array<i64: 9, 8, 512>}, {transform_indices = @transform_7, window_bounds = array<i64: 8, 512>}]} {
    %c0 = arith.constant 0 : index
    %c0_0 = arith.constant 0 : index
    %0 = vector.load %arg1[%c0, %c0_0] : memref<8x512xf32, #tpu.memory_space<vmem>>, vector<8x512xf32>
    %c0_1 = arith.constant 0 : index
    %c0_2 = arith.constant 0 : index
    %1 = vector.load %arg2[%c0_1, %c0_2] : memref<8x1xf32, #tpu.memory_space<vmem>>, vector<8x1xf32>
    %2 = vector.broadcast %1 : vector<8x1xf32> to vector<8x512xf32>
    %3 = arith.mulf %0, %2 : vector<8x512xf32>
    %c0_3 = arith.constant 0 : index
    %c0_4 = arith.constant 0 : index
    %4 = vector.load %arg3[%c0_3, %c0_4] : memref<8x1xf32, #tpu.memory_space<vmem>>, vector<8x1xf32>
    %5 = vector.broadcast %4 : vector<8x1xf32> to vector<8x512xf32>
    %6 = arith.addf %3, %5 : vector<8x512xf32>
    %cst = arith.constant 0.000000e+00 : f32
    %7 = vector.broadcast %cst : f32 to vector<8x512xf32>
    %8 = arith.maximumf %6, %7 : vector<8x512xf32>
    %c0_5 = arith.constant 0 : index
    %c0_6 = arith.constant 0 : index
    %9 = vector.load %arg4[%c0_5, %c0_6] : memref<32x8xbf16, #tpu.memory_space<vmem>>, vector<32x8xbf16>
    %10 = arith.truncf %8 : vector<8x512xf32> to vector<8x512xbf16>
    %cst_7 = arith.constant dense<0.000000e+00> : vector<32x512xf32>
    %11 = tpu.matmul %9, %10, %cst_7 {dimension_numbers = #tpu.dot_dimension_numbers<[1], [0], [0], [1], [0, 0, 1, 1], [], []>} : vector<32x8xbf16>, vector<8x512xbf16>, vector<32x512xf32> -> vector<32x512xf32>
    %c0_8 = arith.constant 0 : index
    %c0_9 = arith.constant 0 : index
    %12 = vector.load %arg5[%c0_8, %c0_9] : memref<32x1xf32, #tpu.memory_space<vmem>>, vector<32x1xf32>
    %13 = vector.broadcast %12 : vector<32x1xf32> to vector<32x512xf32>
    %14 = arith.addf %11, %13 : vector<32x512xf32>
    %cst_10 = arith.constant 0.000000e+00 : f32
    %15 = vector.broadcast %cst_10 : f32 to vector<32x512xf32>
    %16 = arith.maximumf %14, %15 : vector<32x512xf32>
    %c0_11 = arith.constant 0 : index
    %c0_12 = arith.constant 0 : index
    %17 = vector.load %arg6[%c0_11, %c0_12] : memref<72x32xbf16, #tpu.memory_space<vmem>>, vector<72x32xbf16>
    %18 = arith.truncf %16 : vector<32x512xf32> to vector<32x512xbf16>
    %cst_13 = arith.constant dense<0.000000e+00> : vector<72x512xf32>
    %19 = tpu.matmul %17, %18, %cst_13 {dimension_numbers = #tpu.dot_dimension_numbers<[1], [0], [0], [1], [0, 0, 1, 1], [], []>} : vector<72x32xbf16>, vector<32x512xbf16>, vector<72x512xf32> -> vector<72x512xf32>
    %20 = vector.extract_strided_slice %19 {offsets = [32, 0], sizes = [8, 512], strides = [1, 1]} : vector<72x512xf32> to vector<8x512xf32>
    %21 = vector.extract_strided_slice %19 {offsets = [0, 0], sizes = [8, 512], strides = [1, 1]} : vector<72x512xf32> to vector<8x512xf32>
    %c17_i32 = arith.constant 17 : i32
    %22 = tpu.dynamic_rotate %21 by %c17_i32 dim 1 : vector<8x512xf32>, i32 -> vector<8x512xf32>
    %c0_14 = arith.constant 0 : index
    %c0_15 = arith.constant 0 : index
    %c0_16 = arith.constant 0 : index
    %23 = vector.load %arg7[%c0_14, %c0_15, %c0_16] : memref<9x8x512xf32, #tpu.memory_space<vmem>>, vector<1x8x512xf32>
    %24 = vector.shape_cast %23 : vector<1x8x512xf32> to vector<8x512xf32>
    %25 = arith.mulf %22, %24 : vector<8x512xf32>
    %26 = arith.addf %20, %25 : vector<8x512xf32>
    %27 = vector.extract_strided_slice %19 {offsets = [8, 0], sizes = [8, 512], strides = [1, 1]} : vector<72x512xf32> to vector<8x512xf32>
    %c16_i32 = arith.constant 16 : i32
    %28 = tpu.dynamic_rotate %27 by %c16_i32 dim 1 : vector<8x512xf32>, i32 -> vector<8x512xf32>
    %c1 = arith.constant 1 : index
    %c0_17 = arith.constant 0 : index
    %c0_18 = arith.constant 0 : index
    %29 = vector.load %arg7[%c1, %c0_17, %c0_18] : memref<9x8x512xf32, #tpu.memory_space<vmem>>, vector<1x8x512xf32>
    %30 = vector.shape_cast %29 : vector<1x8x512xf32> to vector<8x512xf32>
    %31 = arith.mulf %28, %30 : vector<8x512xf32>
    %32 = arith.addf %26, %31 : vector<8x512xf32>
    %33 = vector.extract_strided_slice %19 {offsets = [16, 0], sizes = [8, 512], strides = [1, 1]} : vector<72x512xf32> to vector<8x512xf32>
    %c15_i32 = arith.constant 15 : i32
    %34 = tpu.dynamic_rotate %33 by %c15_i32 dim 1 : vector<8x512xf32>, i32 -> vector<8x512xf32>
    %c2 = arith.constant 2 : index
    %c0_19 = arith.constant 0 : index
    %c0_20 = arith.constant 0 : index
    %35 = vector.load %arg7[%c2, %c0_19, %c0_20] : memref<9x8x512xf32, #tpu.memory_space<vmem>>, vector<1x8x512xf32>
    %36 = vector.shape_cast %35 : vector<1x8x512xf32> to vector<8x512xf32>
    %37 = arith.mulf %34, %36 : vector<8x512xf32>
    %38 = arith.addf %32, %37 : vector<8x512xf32>
    %39 = vector.extract_strided_slice %19 {offsets = [24, 0], sizes = [8, 512], strides = [1, 1]} : vector<72x512xf32> to vector<8x512xf32>
    %c1_i32 = arith.constant 1 : i32
    %40 = tpu.dynamic_rotate %39 by %c1_i32 dim 1 : vector<8x512xf32>, i32 -> vector<8x512xf32>
    %c3 = arith.constant 3 : index
    %c0_21 = arith.constant 0 : index
    %c0_22 = arith.constant 0 : index
    %41 = vector.load %arg7[%c3, %c0_21, %c0_22] : memref<9x8x512xf32, #tpu.memory_space<vmem>>, vector<1x8x512xf32>
    %42 = vector.shape_cast %41 : vector<1x8x512xf32> to vector<8x512xf32>
    %43 = arith.mulf %40, %42 : vector<8x512xf32>
    %44 = arith.addf %38, %43 : vector<8x512xf32>
    %45 = vector.extract_strided_slice %19 {offsets = [40, 0], sizes = [8, 512], strides = [1, 1]} : vector<72x512xf32> to vector<8x512xf32>
    %c511_i32 = arith.constant 511 : i32
    %46 = tpu.dynamic_rotate %45 by %c511_i32 dim 1 : vector<8x512xf32>, i32 -> vector<8x512xf32>
    %c5 = arith.constant 5 : index
    %c0_23 = arith.constant 0 : index
    %c0_24 = arith.constant 0 : index
    %47 = vector.load %arg7[%c5, %c0_23, %c0_24] : memref<9x8x512xf32, #tpu.memory_space<vmem>>, vector<1x8x512xf32>
    %48 = vector.shape_cast %47 : vector<1x8x512xf32> to vector<8x512xf32>
    %49 = arith.mulf %46, %48 : vector<8x512xf32>
    %50 = arith.addf %44, %49 : vector<8x512xf32>
    %51 = vector.extract_strided_slice %19 {offsets = [48, 0], sizes = [8, 512], strides = [1, 1]} : vector<72x512xf32> to vector<8x512xf32>
    %c497_i32 = arith.constant 497 : i32
    %52 = tpu.dynamic_rotate %51 by %c497_i32 dim 1 : vector<8x512xf32>, i32 -> vector<8x512xf32>
    %c6 = arith.constant 6 : index
    %c0_25 = arith.constant 0 : index
    %c0_26 = arith.constant 0 : index
    %53 = vector.load %arg7[%c6, %c0_25, %c0_26] : memref<9x8x512xf32, #tpu.memory_space<vmem>>, vector<1x8x512xf32>
    %54 = vector.shape_cast %53 : vector<1x8x512xf32> to vector<8x512xf32>
    %55 = arith.mulf %52, %54 : vector<8x512xf32>
    %56 = arith.addf %50, %55 : vector<8x512xf32>
    %57 = vector.extract_strided_slice %19 {offsets = [56, 0], sizes = [8, 512], strides = [1, 1]} : vector<72x512xf32> to vector<8x512xf32>
    %c496_i32 = arith.constant 496 : i32
    %58 = tpu.dynamic_rotate %57 by %c496_i32 dim 1 : vector<8x512xf32>, i32 -> vector<8x512xf32>
    %c7 = arith.constant 7 : index
    %c0_27 = arith.constant 0 : index
    %c0_28 = arith.constant 0 : index
    %59 = vector.load %arg7[%c7, %c0_27, %c0_28] : memref<9x8x512xf32, #tpu.memory_space<vmem>>, vector<1x8x512xf32>
    %60 = vector.shape_cast %59 : vector<1x8x512xf32> to vector<8x512xf32>
    %61 = arith.mulf %58, %60 : vector<8x512xf32>
    %62 = arith.addf %56, %61 : vector<8x512xf32>
    %63 = vector.extract_strided_slice %19 {offsets = [64, 0], sizes = [8, 512], strides = [1, 1]} : vector<72x512xf32> to vector<8x512xf32>
    %c495_i32 = arith.constant 495 : i32
    %64 = tpu.dynamic_rotate %63 by %c495_i32 dim 1 : vector<8x512xf32>, i32 -> vector<8x512xf32>
    %c8 = arith.constant 8 : index
    %c0_29 = arith.constant 0 : index
    %c0_30 = arith.constant 0 : index
    %65 = vector.load %arg7[%c8, %c0_29, %c0_30] : memref<9x8x512xf32, #tpu.memory_space<vmem>>, vector<1x8x512xf32>
    %66 = vector.shape_cast %65 : vector<1x8x512xf32> to vector<8x512xf32>
    %67 = arith.mulf %64, %66 : vector<8x512xf32>
    %68 = arith.addf %62, %67 : vector<8x512xf32>
    %c0_31 = arith.constant 0 : index
    %c0_32 = arith.constant 0 : index
    %69 = vector.load %arg8[%c0_31, %c0_32] : memref<8x512xf32, #tpu.memory_space<vmem>>, vector<8x512xf32>
    tpu.vector_store %arg8[%c0_31, %c0_32], %68 {strides = array<i32>} : memref<8x512xf32, #tpu.memory_space<vmem>>, vector<8x512xf32>,
    return
  }
  func.func @transform_0(%arg0: i32) -> (i32, i32) {
    %c0_i32 = arith.constant 0 : i32
    %c0_i32_0 = arith.constant 0 : i32
    return %c0_i32, %arg0 : i32, i32
  }
  func.func @transform_1(%arg0: i32) -> (i32, i32) {
    %c0_i32 = arith.constant 0 : i32
    %c0_i32_0 = arith.constant 0 : i32
    %c0_i32_1 = arith.constant 0 : i32
    return %c0_i32, %c0_i32_0 : i32, i32
  }
  func.func @transform_2(%arg0: i32) -> (i32, i32) {
    %c0_i32 = arith.constant 0 : i32
    %c0_i32_0 = arith.constant 0 : i32
    %c0_i32_1 = arith.constant 0 : i32
    return %c0_i32, %c0_i32_0 : i32, i32
  }
  func.func @transform_3(%arg0: i32) -> (i32, i32) {
    %c0_i32 = arith.constant 0 : i32
    %c0_i32_0 = arith.constant 0 : i32
    %c0_i32_1 = arith.constant 0 : i32
    return %c0_i32, %c0_i32_0 : i32, i32
  }
  func.func @transform_4(%arg0: i32) -> (i32, i32) {
    %c0_i32 = arith.constant 0 : i32
    %c0_i32_0 = arith.constant 0 : i32
    %c0_i32_1 = arith.constant 0 : i32
    return %c0_i32, %c0_i32_0 : i32, i32
  }
  func.func @transform_5(%arg0: i32) -> (i32, i32) {
    %c0_i32 = arith.constant 0 : i32
    %c0_i32_0 = arith.constant 0 : i32
    %c0_i32_1 = arith.constant 0 : i32
    return %c0_i32, %c0_i32_0 : i32, i32
  }
  func.func @transform_6(%arg0: i32) -> (i32, i32, i32) {
    %c0_i32 = arith.constant 0 : i32
    %c0_i32_0 = arith.constant 0 : i32
    %c0_i32_1 = arith.constant 0 : i32
    %c0_i32_2 = arith.constant 0 : i32
    return %c0_i32, %c0_i32_0, %c0_i32_1 : i32, i32, i32
  }
  func.func @transform_7(%arg0: i32) -> (i32, i32) {
    %c0_i32 = arith.constant 0 : i32
    %c0_i32_0 = arith.constant 0 : i32
    return %c0_i32, %arg0 : i32, i32
  }
}

</mosaic_0001>

<bundles_post_ra>
// kernel: dense_layer_forward.1
= control target key start
LH: loop header
LB: loop body
LE: loop exit
PB: predicated region body
PF: predicated region fallthrough
CT: control target
= control target key end

     0   :  { %v712_v0 = vmov 0   ;;  %vm104_vm0 = vcmask 1043456   ;;  %vm97_vm1 = vcmask 64512   ;;  %vm249_vm2 = vcmask 261120   ;;  %s713_s30 = smov 17   ;;  %s715_s8 = smov 15   ;;  %s1080_s1 = inlined_call_operand.vmem [shape: f32[8,1], index: 1, kind: input, shape index: {}]   ;;  %s1081_s2 = inlined_call_operand.vmem [shape: f32[8,1], index: 2, kind: input, shape index: {}]   ;;  %s1082_s0 = inlined_call_operand.vmem [shape: f32[8,512], index: 0, kind: input, shape index: {}]   ;;  %s1083_s4 = inlined_call_operand.vmem [shape: f32[32,1], index: 4, kind: input, shape index: {}]   ;;  %s1084_s3 = inlined_call_operand.vmem [shape: bf16[32,8], index: 3, kind: input, shape index: {}]   ;;  %s1085_s5 = inlined_call_operand.vmem [shape: bf16[72,32], index: 5, kind: input, shape index: {}]   ;;  %s1086_s6 = inlined_call_operand.vmem [shape: f32[9,8,512], index: 6, kind: input, shape index: {}]   ;;  %s1087_s7 = inlined_call_operand.vmem [shape: f32[8,512], index: 7, kind: output, shape index: {}]  }
   0x1   :  { %709 = vset.pattern.permute.xlu0 %v712_v0  ;;  %v31_v1 = vld [vmem:[%s1080_s1] sm:$0xff]  ;;  %710 = vset.pattern.permute.xlu1 %v712_v0  ;;  %v28_v5 = vld [vmem:[%s1082_s0 + $0x8] sm:$0xff]  ;;  %v29_v6 = vld [vmem:[%s1082_s0 + $0x10] sm:$0xff]  ;;  %s716_s9 = smov 1   ;;  %s717_s10 = smov 127  }
   0x2   :  { %34 = vperm.xlu0 %709, %v31_v1   ;;  %711 = vset.pattern.permute.xlu2 %v712_v0  ;;  %v41_v2 = vld [vmem:[%s1081_s2] sm:$0xff]  ;;  %v30_v7 = vld [vmem:[%s1082_s0 + $0x18] sm:$0xff]  ;;  %v65_v8 = vld [vmem:[%s1083_s4 + $0x10] sm:$0xff]  ;;  %s718_s1 = smov 113   ;;  %s719_s11 = smov 112  }
   0x3   :  { %v27_v4 = vld [vmem:[%s1082_s0] sm:$0xff]  ;;  %79 = vperm.xlu1 %710, %v65_v8   ;;  %v66_v19 = vld [vmem:[%s1083_s4 + $0x18] sm:$0xff]  ;;  %v64_v24 = vld [vmem:[%s1083_s4 + $0x8] sm:$0xff]  ;;  %s720_s12 = smov 111  }
   0x4   :  { %v63_v9 = vld [vmem:[%s1083_s4] sm:$0xff]  ;;  %v695_v34 = vld [vmem:[%s1084_s3 + $0x8] sm:$0xff] }
   0x5   :  { %69 = vperm.xlu2 %711, %v63_v9   ;;  %v694_v33 = vld [vmem:[%s1084_s3] sm:$0xff] }
   0xa   :  { %44 = vperm.xlu0 %709, %v41_v2  }
   0xb   :  { %84 = vperm.xlu1 %710, %v66_v19  }
   0xd   :  { %74 = vperm.xlu2 %711, %v64_v24   ;;  %v696_v24 = vld [vmem:[%s1085_s5] sm:$0xff] }
  0x5f   :  { %v70_v41 = vpop.permute.xlu2 %69 }
  0x67   :  { %v75_v47 = vpop.permute.xlu2 %74 }
  0x74   :  { %v35_v3 = vpop.permute.xlu0 %34 }
  0x75   :  { %v37_v10 = vmul.f32 %v35_v3, %v27_v4  ;;  %v38_v11 = vmul.f32 %v35_v3, %v28_v5  ;;  %v39_v12 = vmul.f32 %v35_v3, %v29_v6  ;;  %v40_v13 = vmul.f32 %v35_v3, %v30_v7  ;;  %v80_v42 = vpop.permute.xlu1 %79 }
  0x7c   :  { %v45_v14 = vpop.permute.xlu0 %44 }
  0x7d   :  { %v47_v15 = vadd.f32 %v45_v14, %v37_v10  ;;  %v48_v16 = vadd.f32 %v45_v14, %v38_v11  ;;  %v49_v17 = vadd.f32 %v45_v14, %v39_v12  ;;  %v50_v18 = vadd.f32 %v45_v14, %v40_v13  ;;  %v85_v48 = vpop.permute.xlu1 %84 }
  0x7f   :  { %v51_v20 = vmax.f32 %v47_v15, 0.0  ;;  %v52_v21 = vmax.f32 %v48_v16, 0.0  ;;  %v53_v22 = vmax.f32 %v49_v17, 0.0  ;;  %v54_v23 = vmax.f32 %v50_v18, 0.0 }
  0x81   :  { %v59_v25 = vpack.c.bf16 %v51_v20, %v51_v20  ;;  %v60_v26 = vpack.c.bf16 %v52_v21, %v52_v21  ;;  %v61_v27 = vpack.c.bf16 %v53_v22, %v53_v22  ;;  %v62_v28 = vpack.c.bf16 %v54_v23, %v54_v23 }
  0x83   :  { %v106_v29 = vsel %vm104_vm0, %v59_v25, 0  ;;  %v109_v30 = vsel %vm104_vm0, %v60_v26, 0  ;;  %v112_v31 = vsel %vm104_vm0, %v61_v27, 0  ;;  %v115_v32 = vsel %vm104_vm0, %v62_v28, 0 }
  0x84   :  { %124 = vmatpush.bf16.msra.mxu0 %v106_v29  ;;  %143 = vmatpush.bf16.msra.mxu1 %v109_v30 }
  0x85   :  { %162 = vmatpush.bf16.msra.mxu2 %v112_v31  ;;  %181 = vmatpush.bf16.msra.mxu3 %v115_v32  ;;  %v697_v32 = vld [vmem:[%s1085_s5 + $0x8] sm:$0xff] }
  0x87   :  { %622 = vmatmul.msk.bf16.vlgmr.msra.gmra.mxu0 %vm97_vm1, %v694_v33  ;;  %624 = vmatmul.msk.bf16.vlgmr.msra.gmra.mxu1 %vm97_vm1, %v694_v33 }
  0x88   :  { %626 = vmatmul.msk.bf16.vlgmr.msra.gmra.mxu2 %vm97_vm1, %v694_v33  ;;  %628 = vmatmul.msk.bf16.vlgmr.msra.gmra.mxu3 %vm97_vm1, %v694_v33  ;;  %v698_v33 = vld [vmem:[%s1085_s5 + $0x10] sm:$0xff] }
  0x97   :  { %623 = vmatmul.msk.bf16.gmra.mxu0 %vm97_vm1, %v695_v34  ;;  %625 = vmatmul.msk.bf16.gmra.mxu1 %vm97_vm1, %v695_v34 }
  0x98   :  { %627 = vmatmul.msk.bf16.gmra.mxu2 %vm97_vm1, %v695_v34  ;;  %629 = vmatmul.msk.bf16.gmra.mxu3 %vm97_vm1, %v695_v34  ;;  %v699_v34 = vld [vmem:[%s1085_s5 + $0x18] sm:$0xff] }
 0x104   :  { %v126_v35 = vpop.f32.mrf.mxu0  ;;  %v145_v36 = vpop.f32.mrf.mxu1 }
 0x105   :  { %v127_v59 = vadd.f32 %v126_v35, %v70_v41  ;;  %v146_v60 = vadd.f32 %v145_v36, %v70_v41  ;;  %v217_v35 = vld [vmem:[%s1085_s5 + $0x20] sm:$0xf]  ;;  %s714_s5 = smov 16  }
 0x106   :  { %v243_v36 = vunpack.c.l.b16 %v217_v35 }
 0x107   :  { %v193_v7 = vmax.f32 %v127_v59, 0.0  ;;  %v194_v8 = vmax.f32 %v146_v60, 0.0 }
 0x10b   :  { %v164_v37 = vpop.f32.mrf.mxu2  ;;  %v183_v38 = vpop.f32.mrf.mxu3 }
 0x10c   :  { %v128_v39 = vpop.f32.mrf.mxu0  ;;  %v147_v40 = vpop.f32.mrf.mxu1  ;;  %v165_v9 = vadd.f32 %v164_v37, %v70_v41  ;;  %v184_v16 = vadd.f32 %v183_v38, %v70_v41  ;;  %v248_v37 = vpack.c.b16 %v243_v36, %v243_v36 }
 0x10d   :  { %v129_v55 = vadd.f32 %v128_v39, %v75_v47  ;;  %v148_v56 = vadd.f32 %v147_v40, %v75_v47 }
 0x10e   :  { %v195_v23 = vmax.f32 %v165_v9, 0.0  ;;  %v196_v29 = vmax.f32 %v184_v16, 0.0 }
 0x10f   :  { %v197_v1 = vmax.f32 %v129_v55, 0.0  ;;  %v198_v2 = vmax.f32 %v148_v56, 0.0 }
 0x111   :  { %v218_v17 = vpack.c.bf16 %v197_v1, %v193_v7  ;;  %v219_v18 = vpack.c.bf16 %v198_v2, %v194_v8 }
 0x113   :  { %v166_v43 = vpop.f32.mrf.mxu2  ;;  %v185_v44 = vpop.f32.mrf.mxu3 }
 0x114   :  { %v131_v45 = vpop.f32.mrf.mxu0  ;;  %v150_v46 = vpop.f32.mrf.mxu1  ;;  %v167_v12 = vadd.f32 %v166_v43, %v75_v47  ;;  %v186_v13 = vadd.f32 %v185_v44, %v75_v47 }
 0x115   :  { %v132_v49 = vadd.f32 %v131_v45, %v80_v42  ;;  %v151_v50 = vadd.f32 %v150_v46, %v80_v42 }
 0x116   :  { %v199_v25 = vmax.f32 %v167_v12, 0.0  ;;  %v200_v26 = vmax.f32 %v186_v13, 0.0 }
 0x117   :  { %v201_v61 = vmax.f32 %v132_v49, 0.0  ;;  %v202_v62 = vmax.f32 %v151_v50, 0.0 }
 0x118   :  { %v220_v30 = vpack.c.bf16 %v199_v25, %v195_v23  ;;  %v221_v31 = vpack.c.bf16 %v200_v26, %v196_v29 }
 0x11b   :  { %v169_v51 = vpop.f32.mrf.mxu2  ;;  %v188_v52 = vpop.f32.mrf.mxu3 }
 0x11c   :  { %v133_v53 = vpop.f32.mrf.mxu0  ;;  %v152_v54 = vpop.f32.mrf.mxu1  ;;  %v170_v5 = vadd.f32 %v169_v51, %v80_v42  ;;  %v189_v6 = vadd.f32 %v188_v52, %v80_v42 }
 0x11d   :  { %v134_v57 = vadd.f32 %v133_v53, %v85_v48  ;;  %v153_v58 = vadd.f32 %v152_v54, %v85_v48 }
 0x11e   :  { %v203_v19 = vmax.f32 %v170_v5, 0.0  ;;  %v204_v20 = vmax.f32 %v189_v6, 0.0 }
 0x11f   :  { %v205_v63 = vmax.f32 %v134_v57, 0.0  ;;  %v206_v0 = vmax.f32 %v153_v58, 0.0 }
 0x121   :  { %v222_v3 = vpack.c.bf16 %v205_v63, %v201_v61  ;;  %v223_v4 = vpack.c.bf16 %v206_v0, %v202_v62 }
 0x123   :  { %v171_v10 = vpop.f32.mrf.mxu2  ;;  %v190_v11 = vpop.f32.mrf.mxu3  ;;  %271 = vmatpush.bf16.msrb.mxu0 %v222_v3  ;;  %304 = vmatpush.bf16.msrb.mxu1 %v223_v4 }
 0x124   :  { %v172_v14 = vadd.f32 %v171_v10, %v85_v48  ;;  %v191_v15 = vadd.f32 %v190_v11, %v85_v48 }
 0x126   :  { %v207_v21 = vmax.f32 %v172_v14, 0.0  ;;  %v208_v22 = vmax.f32 %v191_v15, 0.0  ;;  %v405_v15 = vlaneseq }
 0x127   :  { %272 = vmatpush.bf16.msrb.mxu0 %v218_v17  ;;  %305 = vmatpush.bf16.msrb.mxu1 %v219_v18 }
 0x128   :  { %v224_v27 = vpack.c.bf16 %v207_v21, %v203_v19  ;;  %v225_v28 = vpack.c.bf16 %v208_v22, %v204_v20  ;;  %v840_v16 = vand.u32 127, %v405_v15  ;;  %v413_v21 = vld [vmem:[%s1086_s6 + $0x8] sm:$0xff] }
 0x12a   :  { %337 = vmatpush.bf16.msrb.mxu2 %v224_v27  ;;  %370 = vmatpush.bf16.msrb.mxu3 %v225_v28  ;;  %vm407_vm3 = vcmp.lt.s32.totalorder %v840_v16, 17  ;;  %vm432_vm4 = vcmp.lt.s32.totalorder %v840_v16, 16  ;;  %vm458_vm5 = vcmp.lt.s32.totalorder %v840_v16, 15  ;;  %vm484_vm6 = vcmp.lt.s32.totalorder %v840_v16, 1 }
 0x12b   :  { %646 = vmatmul.msk.bf16.vlgmr.msrb.gmra.mxu0 %vm249_vm2, %v696_v24  ;;  %651 = vmatmul.msk.bf16.vlgmr.msrb.gmra.mxu1 %vm249_vm2, %v696_v24  ;;  %vm510_vm7 = vcmp.lt.s32.totalorder %v840_v16, 127  ;;  %vm536_vm8 = vcmp.lt.s32.totalorder %v840_v16, 113  ;;  %vm562_vm9 = vcmp.lt.s32.totalorder %v840_v16, 112  ;;  %vm588_vm10 = vcmp.lt.s32.totalorder %v840_v16, 111 }
 0x12e   :  { %338 = vmatpush.bf16.msrb.mxu2 %v220_v30  ;;  %371 = vmatpush.bf16.msrb.mxu3 %v221_v31 }
 0x131   :  { %661 = vmatmul.msk.bf16.vlgmr.msrb.gmra.mxu3 %vm249_vm2, %v696_v24  ;;  %656 = vmatmul.msk.bf16.vlgmr.msrb.gmra.mxu2 %vm249_vm2, %v696_v24  ;;  %v667_v24 = vld [vmem:[%s1086_s6 + $0x28] sm:$0xff] }
 0x13b   :  { %647 = vmatmul.msk.bf16.gmra.mxu0 %vm249_vm2, %v697_v32  ;;  %652 = vmatmul.msk.bf16.gmra.mxu1 %vm249_vm2, %v697_v32 }
 0x141   :  { %662 = vmatmul.msk.bf16.gmra.mxu3 %vm249_vm2, %v697_v32  ;;  %657 = vmatmul.msk.bf16.gmra.mxu2 %vm249_vm2, %v697_v32 }
 0x14b   :  { %648 = vmatmul.msk.bf16.gmra.mxu0 %vm249_vm2, %v698_v33  ;;  %653 = vmatmul.msk.bf16.gmra.mxu1 %vm249_vm2, %v698_v33 }
 0x151   :  { %663 = vmatmul.msk.bf16.gmra.mxu3 %vm249_vm2, %v698_v33  ;;  %658 = vmatmul.msk.bf16.gmra.mxu2 %vm249_vm2, %v698_v33 }
 0x15b   :  { %654 = vmatmul.msk.bf16.gmra.mxu1 %vm249_vm2, %v699_v34  ;;  %649 = vmatmul.msk.bf16.gmra.mxu0 %vm249_vm2, %v699_v34 }
 0x161   :  { %659 = vmatmul.msk.bf16.gmra.mxu2 %vm249_vm2, %v699_v34  ;;  %664 = vmatmul.msk.bf16.gmra.mxu3 %vm249_vm2, %v699_v34  ;;  %v414_v34 = vld [vmem:[%s1086_s6 + $0x10] sm:$0xff] }
 0x16b   :  { %650 = vmatmul.msk.bf16.gmra.mxu0 %vm249_vm2, %v248_v37  ;;  %655 = vmatmul.msk.bf16.gmra.mxu1 %vm249_vm2, %v248_v37 }
 0x171   :  { %660 = vmatmul.msk.bf16.gmra.mxu2 %vm249_vm2, %v248_v37  ;;  %665 = vmatmul.msk.bf16.gmra.mxu3 %vm249_vm2, %v248_v37 }
 0x1a8   :  { %v274_v38 = vpop.f32.mrf.mxu0  ;;  %v307_v39 = vpop.f32.mrf.mxu1 }
 0x1a9   :  { %399 = vrot.lane.b32.xlu1 %v307_v39, %s713_s30  ;;  %397 = vrot.lane.b32.xlu0 %v274_v38, %s713_s30  ;;  %v668_v38 = vld [vmem:[%s1086_s6 + $0x30] sm:$0xff] }
 0x1b0   :  { %v276_v40 = vpop.f32.mrf.mxu0  ;;  %v309_v41 = vpop.f32.mrf.mxu1 }
 0x1b1   :  { %424 = vrot.lane.b32.xlu1 %v276_v40, %s714_s5  ;;  %426 = vrot.lane.b32.xlu2 %v309_v41, %s714_s5 }
 0x1b4   :  { %v373_v42 = vpop.f32.mrf.mxu3  ;;  %v340_v43 = vpop.f32.mrf.mxu2 }
 0x1b5   :  { %403 = vrot.lane.b32.xlu0 %v373_v42, %s713_s30 }
 0x1b8   :  { %v279_v44 = vpop.f32.mrf.mxu0  ;;  %v312_v45 = vpop.f32.mrf.mxu1 }
 0x1b9   :  { %401 = vrot.lane.b32.xlu2 %v340_v43, %s713_s30 }
 0x1bc   :  { %v375_v46 = vpop.f32.mrf.mxu3  ;;  %v342_v47 = vpop.f32.mrf.mxu2 }
 0x1bd   :  { %452 = vrot.lane.b32.xlu0 %v312_v45, %s715_s8  ;;  %430 = vrot.lane.b32.xlu1 %v375_v46, %s714_s5 }
 0x1c0   :  { %v281_v48 = vpop.f32.mrf.mxu0  ;;  %v314_v49 = vpop.f32.mrf.mxu1 }
 0x1c1   :  { %450 = vrot.lane.b32.xlu2 %v279_v44, %s715_s8 }
 0x1c4   :  { %v378_v50 = vpop.f32.mrf.mxu3  ;;  %v345_v51 = vpop.f32.mrf.mxu2 }
 0x1c5   :  { %428 = vrot.lane.b32.xlu0 %v342_v47, %s714_s5  ;;  %478 = vrot.lane.b32.xlu1 %v314_v49, %s716_s9 }
 0x1c8   :  { %v832_v52 = vpop.f32.mrf.mxu0  ;;  %v834_v53 = vpop.f32.mrf.mxu1 }
 0x1c9   :  { %456 = vrot.lane.b32.xlu2 %v378_v50, %s715_s8 }
 0x1cc   :  { %v380_v54 = vpop.f32.mrf.mxu3  ;;  %v347_v55 = vpop.f32.mrf.mxu2 }
 0x1cd   :  { %454 = vrot.lane.b32.xlu1 %v345_v51, %s715_s8  ;;  %476 = vrot.lane.b32.xlu0 %v281_v48, %s716_s9 }
 0x1d0   :  { %v286_v56 = vpop.f32.mrf.mxu0  ;;  %v319_v57 = vpop.f32.mrf.mxu1 }
 0x1d1   :  { %480 = vrot.lane.b32.xlu2 %v347_v55, %s716_s9 }
 0x1d4   :  { %v836_v58 = vpop.f32.mrf.mxu3  ;;  %v838_v59 = vpop.f32.mrf.mxu2 }
 0x1d5   :  { %482 = vrot.lane.b32.xlu0 %v380_v54, %s716_s9  ;;  %502 = vrot.lane.b32.xlu1 %v286_v56, %s717_s10  ;;  %v412_v54 = vld [vmem:[%s1086_s6] sm:$0xff] }
 0x1d8   :  { %v322_v60 = vpop.f32.mrf.mxu1  ;;  %v289_v61 = vpop.f32.mrf.mxu0 }
 0x1d9   :  { %504 = vrot.lane.b32.xlu2 %v319_v57, %s717_s10  ;;  %v666_v57 = vld [vmem:[%s1086_s6 + $0x20] sm:$0xff] }
 0x1dc   :  { %v385_v62 = vpop.f32.mrf.mxu3  ;;  %v352_v63 = vpop.f32.mrf.mxu2 }
 0x1dd   :  { %530 = vrot.lane.b32.xlu0 %v322_v60, %s718_s1  ;;  %508 = vrot.lane.b32.xlu1 %v385_v62, %s717_s10 }
 0x1e0   :  { %v324_v0 = vpop.f32.mrf.mxu1  ;;  %v291_v1 = vpop.f32.mrf.mxu0 }
 0x1e1   :  { %528 = vrot.lane.b32.xlu2 %v289_v61, %s718_s1 }
 0x1e4   :  { %v355_v2 = vpop.f32.mrf.mxu2  ;;  %v388_v3 = vpop.f32.mrf.mxu3 }
 0x1e5   :  { %506 = vrot.lane.b32.xlu0 %v352_v63, %s717_s10  ;;  %556 = vrot.lane.b32.xlu1 %v324_v0, %s719_s11  ;;  %v415_v0 = vld [vmem:[%s1086_s6 + $0x18] sm:$0xff] }
 0x1e8   :  { %v294_v4 = vpop.f32.mrf.mxu0  ;;  %v327_v5 = vpop.f32.mrf.mxu1 }
 0x1e9   :  { %534 = vrot.lane.b32.xlu2 %v388_v3, %s718_s1  ;;  %v671_v3 = vld [vmem:[%s1086_s6 + $0x48] sm:$0xff] }
 0x1ec   :  { %v357_v6 = vpop.f32.mrf.mxu2  ;;  %v390_v7 = vpop.f32.mrf.mxu3 }
 0x1ed   :  { %532 = vrot.lane.b32.xlu1 %v355_v2, %s718_s1  ;;  %554 = vrot.lane.b32.xlu0 %v291_v1, %s719_s11 }
 0x1f0   :  { %v296_v8 = vpop.f32.mrf.mxu0  ;;  %v329_v9 = vpop.f32.mrf.mxu1 }
 0x1f1   :  { %558 = vrot.lane.b32.xlu2 %v357_v6, %s719_s11 }
 0x1f4   :  { %v360_v10 = vpop.f32.mrf.mxu2  ;;  %v393_v11 = vpop.f32.mrf.mxu3 }
 0x1f5   :  { %560 = vrot.lane.b32.xlu0 %v390_v7, %s719_s11  ;;  %580 = vrot.lane.b32.xlu1 %v294_v4, %s720_s12 }
 0x1f9   :  { %582 = vrot.lane.b32.xlu2 %v327_v5, %s720_s12  ;;  %v670_v5 = vld [vmem:[%s1086_s6 + $0x40] sm:$0xff] }
 0x1fc   :  { %v362_v12 = vpop.f32.mrf.mxu2  ;;  %v395_v13 = vpop.f32.mrf.mxu3 }
 0x1fd   :  { %584 = vrot.lane.b32.xlu0 %v360_v10, %s720_s12  ;;  %586 = vrot.lane.b32.xlu1 %v393_v11, %s720_s12  ;;  %v669_v11 = vld [vmem:[%s1086_s6 + $0x38] sm:$0xff] }
 0x20b   :  { %v427_v14 = vpop.permute.xlu2 %426 }
 0x213   :  { %v402_v17 = vpop.permute.xlu2 %401 }
 0x21b   :  { %v400_v18 = vpop.permute.xlu1 %399  ;;  %v398_v19 = vpop.permute.xlu0 %397 }
 0x21c   :  { %v410_v20 = vsel %vm407_vm3, %v398_v19, %v400_v18  ;;  %v451_v22 = vpop.permute.xlu2 %450  ;;  %v409_v35 = vsel %vm407_vm3, %v400_v18, %v402_v17 }
 0x21d   :  { %v417_v23 = vmul.f32 %v413_v21, %v410_v20  ;;  %v418_v37 = vmul.f32 %v414_v34, %v409_v35  ;;  %v673_v21 = vld [vmem:[%s1086_s6 + $0x58] sm:$0xff] }
 0x21f   :  { %v421_v27 = vadd.f32 %v417_v23, %v834_v53  ;;  %v422_v42 = vadd.f32 %v418_v37, %v838_v59  ;;  %v675_v23 = vld [vmem:[%s1086_s6 + $0x68] sm:$0xff] }
 0x223   :  { %v425_v25 = vpop.permute.xlu1 %424 }
 0x224   :  { %v435_v26 = vsel %vm432_vm4, %v425_v25, %v427_v14  ;;  %v457_v31 = vpop.permute.xlu2 %456 }
 0x225   :  { %v443_v28 = vmul.f32 %v667_v24, %v435_v26  ;;  %v462_v6 = vsel %vm458_vm5, %v457_v31, %v451_v22 }
 0x226   :  { %v468_v13 = vmul.f32 %v670_v5, %v462_v6  ;;  %v690_v6 = vld [vmem:[%s1086_s6 + $0x100] sm:$0xff] }
 0x227   :  { %v855_v29 = vadd.f32 %v443_v28, %v421_v27  ;;  %v404_v30 = vpop.permute.xlu0 %403 }
 0x228   :  { %v411_v55 = vsel %vm407_vm3, %v404_v30, %v398_v19  ;;  %v408_v1 = vsel %vm407_vm3, %v402_v17, %v404_v30  ;;  %v672_v17 = vld [vmem:[%s1086_s6 + $0x50] sm:$0xff]  ;;  %v678_v30 = vld [vmem:[%s1086_s6 + $0xa0] sm:$0xff] }
 0x229   :  { %v416_v60 = vmul.f32 %v412_v54, %v411_v55  ;;  %v419_v9 = vmul.f32 %v415_v0, %v408_v1 }
 0x22b   :  { %v420_v2 = vadd.f32 %v416_v60, %v832_v52  ;;  %v674_v52 = vld [vmem:[%s1086_s6 + $0x60] sm:$0xff]  ;;  %v423_v27 = vadd.f32 %v419_v9, %v836_v58  ;;  %v683_v60 = vld [vmem:[%s1086_s6 + $0xc8] sm:$0xff] }
 0x22c   :  { %v862_v36 = vpop.permute.xlu2 %480 }
 0x22f   :  { %v453_v32 = vpop.permute.xlu0 %452  ;;  %v431_v33 = vpop.permute.xlu1 %430 }
 0x230   :  { %v436_v59 = vsel %vm432_vm4, %v431_v33, %v425_v25  ;;  %v461_v4 = vsel %vm458_vm5, %v451_v22, %v453_v32 }
 0x231   :  { %v442_v61 = vmul.f32 %v666_v57, %v436_v59  ;;  %v469_v10 = vmul.f32 %v671_v3, %v461_v4  ;;  %v681_v57 = vld [vmem:[%s1086_s6 + $0xb8] sm:$0xff] }
 0x233   :  { %v446_v8 = vadd.f32 %v442_v61, %v420_v2  ;;  %v473_v28 = vadd.f32 %v469_v10, %v855_v29  ;;  %v677_v29 = vld [vmem:[%s1086_s6 + $0x78] sm:$0xff]  ;;  %v680_v61 = vld [vmem:[%s1086_s6 + $0xb0] sm:$0xff] }
 0x234   :  { %v874_v45 = vpop.permute.xlu2 %504 }
 0x235   :  { %v472_v19 = vadd.f32 %v468_v13, %v446_v8  ;;  %v684_v8 = vld [vmem:[%s1086_s6 + $0xd0] sm:$0xff] }
 0x237   :  { %v429_v39 = vpop.permute.xlu0 %428  ;;  %v867_v40 = vpop.permute.xlu1 %478 }
 0x238   :  { %v434_v41 = vsel %vm432_vm4, %v427_v14, %v429_v39  ;;  %v433_v12 = vsel %vm432_vm4, %v429_v39, %v431_v33  ;;  %v679_v39 = vld [vmem:[%s1086_s6 + $0xa8] sm:$0xff] }
 0x239   :  { %v444_v43 = vmul.f32 %v668_v38, %v434_v41  ;;  %v445_v20 = vmul.f32 %v669_v11, %v433_v12 }
 0x23b   :  { %v872_v44 = vadd.f32 %v444_v43, %v422_v42  ;;  %v686_v42 = vld [vmem:[%s1086_s6 + $0xe0] sm:$0xff] }
 0x23c   :  { %v878_v50 = vpop.permute.xlu2 %528 }
 0x23f   :  { %v455_v46 = vpop.permute.xlu1 %454  ;;  %v477_v47 = vpop.permute.xlu0 %476 }
 0x240   :  { %v460_v18 = vsel %vm458_vm5, %v453_v32, %v455_v46  ;;  %v459_v22 = vsel %vm458_vm5, %v455_v46, %v457_v31  ;;  %v487_v24 = vsel %vm484_vm6, %v477_v47, %v867_v40  ;;  %v682_v32 = vld [vmem:[%s1086_s6 + $0xc0] sm:$0xff]  ;;  %v449_v46 = vadd.f32 %v445_v20, %v423_v27 }
 0x241   :  { %v470_v33 = vmul.f32 %v672_v17, %v460_v18  ;;  %v471_v37 = vmul.f32 %v673_v21, %v459_v22  ;;  %v495_v38 = vmul.f32 %v675_v23, %v487_v24  ;;  %v688_v18 = vld [vmem:[%s1086_s6 + $0xf0] sm:$0xff]  ;;  %v685_v21 = vld [vmem:[%s1086_s6 + $0xd8] sm:$0xff]  ;;  %v687_v22 = vld [vmem:[%s1086_s6 + $0xe8] sm:$0xff] }
 0x242   :  { %v689_v24 = vld [vmem:[%s1086_s6 + $0xf8] sm:$0xff] }
 0x243   :  { %v474_v4 = vadd.f32 %v470_v33, %v872_v44  ;;  %v475_v5 = vadd.f32 %v471_v37, %v449_v46 }
 0x244   :  { %v889_v56 = vpop.permute.xlu2 %534 }
 0x245   :  { %v540_v11 = vsel %vm536_vm8, %v889_v56, %v878_v50 }
 0x247   :  { %v483_v48 = vpop.permute.xlu0 %482  ;;  %v876_v49 = vpop.permute.xlu1 %502 }
 0x248   :  { %v488_v7 = vsel %vm484_vm6, %v483_v48, %v477_v47  ;;  %v513_v31 = vsel %vm510_vm7, %v876_v49, %v874_v45  ;;  %v485_v34 = vsel %vm484_vm6, %v862_v36, %v483_v48  ;;  %v676_v47 = vld [vmem:[%s1086_s6 + $0x70] sm:$0xff]  ;;  %v486_v48 = vsel %vm484_vm6, %v867_v40, %v862_v36 }
 0x249   :  { %v494_v14 = vmul.f32 %v674_v52, %v488_v7  ;;  %v497_v55 = vmul.f32 %v677_v29, %v485_v34  ;;  %v496_v3 = vmul.f32 %v676_v47, %v486_v48  ;;  %v693_v34 = vld [vmem:[%s1086_s6 + $0x118] sm:$0xff] }
 0x24b   :  { %v498_v35 = vadd.f32 %v494_v14, %v472_v19  ;;  %v501_v44 = vadd.f32 %v497_v55, %v475_v5 }
 0x24c   :  { %v929_v15 = vpop.permute.xlu2 %558 }
 0x24f   :  { %v880_v51 = vpop.permute.xlu0 %530  ;;  %v882_v53 = vpop.permute.xlu1 %508 }
 0x250   :  { %v539_v58 = vsel %vm536_vm8, %v878_v50, %v880_v51  ;;  %v514_v59 = vsel %vm510_vm7, %v882_v53, %v876_v49  ;;  %v500_v50 = vadd.f32 %v496_v3, %v474_v4 }
 0x251   :  { %v546_v54 = vmul.f32 %v682_v32, %v539_v58  ;;  %v523_v7 = vmul.f32 %v681_v57, %v514_v59  ;;  %v549_v58 = vmul.f32 %v685_v21, %v540_v11 }
 0x253   :  { %v527_v27 = vadd.f32 %v523_v7, %v501_v44 }
 0x254   :  { %v583_v2 = vpop.permute.xlu2 %582 }
 0x257   :  { %v897_v62 = vpop.permute.xlu0 %506  ;;  %v899_v63 = vpop.permute.xlu1 %556 }
 0x258   :  { %v512_v41 = vsel %vm510_vm7, %v874_v45, %v897_v62  ;;  %v520_v45 = vmul.f32 %v678_v30, %v513_v31  ;;  %v511_v49 = vsel %vm510_vm7, %v897_v62, %v882_v53  ;;  %v564_v23 = vsel %vm562_vm9, %v899_v63, %v929_v15 }
 0x259   :  { %v521_v0 = vmul.f32 %v679_v39, %v512_v41  ;;  %v522_v12 = vmul.f32 %v680_v61, %v511_v49  ;;  %v573_v33 = vmul.f32 %v687_v22, %v564_v23 }
 0x25a   :  { %v524_v40 = vadd.f32 %v520_v45, %v498_v35  ;;  %v553_v35 = vadd.f32 %v549_v58, %v527_v27 }
 0x25b   :  { %v526_v31 = vadd.f32 %v522_v12, %v500_v50 }
 0x25c   :  { %v550_v52 = vadd.f32 %v546_v54, %v524_v40 }
 0x25f   :  { %v533_v25 = vpop.permute.xlu1 %532  ;;  %v948_v26 = vpop.permute.xlu0 %554 }
 0x260   :  { %v565_v43 = vsel %vm562_vm9, %v948_v26, %v899_v63  ;;  %v538_v36 = vsel %vm536_vm8, %v880_v51, %v533_v25  ;;  %v499_v51 = vadd.f32 %v495_v38, %v473_v28  ;;  %v537_v53 = vsel %vm536_vm8, %v533_v25, %v889_v56 }
 0x261   :  { %v572_v1 = vmul.f32 %v686_v42, %v565_v43  ;;  %v547_v62 = vmul.f32 %v683_v60, %v538_v36  ;;  %v548_v56 = vmul.f32 %v684_v8, %v537_v53 }
 0x262   :  { %v525_v14 = vadd.f32 %v521_v0, %v499_v51 }
 0x263   :  { %v576_v17 = vadd.f32 %v572_v1, %v550_v52  ;;  %v552_v63 = vadd.f32 %v548_v56, %v526_v31 }
 0x264   :  { %v551_v28 = vadd.f32 %v547_v62, %v525_v14 }
 0x266   :  { %v577_v37 = vadd.f32 %v573_v33, %v551_v28 }
 0x267   :  { %v561_v9 = vpop.permute.xlu0 %560  ;;  %v581_v10 = vpop.permute.xlu1 %580 }
 0x268   :  { %v591_v13 = vsel %vm588_vm10, %v581_v10, %v583_v2  ;;  %v563_v19 = vsel %vm562_vm9, %v929_v15, %v561_v9  ;;  %v566_v25 = vsel %vm562_vm9, %v561_v9, %v948_v26  ;;  %v691_v15 = vld [vmem:[%s1086_s6 + $0x108] sm:$0xff]  ;;  %v692_v26 = vld [vmem:[%s1086_s6 + $0x110] sm:$0xff] }
 0x269   :  { %v598_v20 = vmul.f32 %v690_v6, %v591_v13  ;;  %v574_v32 = vmul.f32 %v688_v18, %v563_v19  ;;  %v575_v29 = vmul.f32 %v689_v24, %v566_v25 }
 0x26b   :  { %v602_v30 = vadd.f32 %v598_v20, %v576_v17  ;;  %v578_v41 = vadd.f32 %v574_v32, %v552_v63  ;;  %v579_v47 = vadd.f32 %v575_v29, %v553_v35 }
 0x26d   :  { %606 = vst [vmem:[%s1087_s7] sm:$0xff] %v602_v30 }
 0x26f   :  { %v585_v38 = vpop.permute.xlu0 %584  ;;  %v587_v39 = vpop.permute.xlu1 %586 }
 0x270   :  { %v590_v42 = vsel %vm588_vm10, %v583_v2, %v585_v38  ;;  %v589_v43 = vsel %vm588_vm10, %v585_v38, %v587_v39  ;;  %v592_v46 = vsel %vm588_vm10, %v587_v39, %v581_v10 }
 0x271   :  { %v599_v48 = vmul.f32 %v691_v15, %v590_v42  ;;  %v600_v45 = vmul.f32 %v692_v26, %v589_v43  ;;  %v601_v54 = vmul.f32 %v693_v34, %v592_v46 }
 0x273   :  { %v603_v55 = vadd.f32 %v599_v48, %v577_v37  ;;  %v604_v57 = vadd.f32 %v600_v45, %v578_v41  ;;  %v605_v59 = vadd.f32 %v601_v54, %v579_v47 }
 0x275   :  { %607 = vst [vmem:[%s1087_s7 + $0x8] sm:$0xff] %v603_v55 }
 0x276   :  { %608 = vst [vmem:[%s1087_s7 + $0x10] sm:$0xff] %v604_v57 }
 0x277   :  { %609 = vst [vmem:[%s1087_s7 + $0x18] sm:$0xff] %v605_v59 }

</bundles_post_ra>
